<compile_context>
chip_gen: v7x
topology: tpu7x:2x2x1
jax: 0.10.0
libtpu: 0.0.40
codegen_flags: <defaults>
</compile_context>

<pallas_src>
import jax
import jax.numpy as jnp
from jax.experimental import pallas as pl
from jax.experimental.pallas import tpu as pltpu


def _round_up(n, m):
    return ((n + m - 1) // m) * m


def _qnet_kernel(x_ref, w1_ref, b1_ref, w2_ref, b2_ref, o_ref):
    # hidden = relu(x @ W1 + b1) — bias add / relu are single VPU ops that
    # co-issue under the MXU result pops.
    h = jnp.dot(x_ref[...], w1_ref[...], preferred_element_type=jnp.float32)
    h = jnp.maximum(h + b1_ref[...], 0.0)
    # out = hidden @ W2 + b2 — output kept at its true (narrow) width.
    o = jnp.dot(h, w2_ref[...], preferred_element_type=jnp.float32)
    o_ref[...] = (o + b2_ref[...]).astype(o_ref.dtype)


def prepare_qnet_params(w1, b1, w2, b2, *, hidden_lane=128):
    """One-time parameter prep (call at model init / after each optimizer step).

    w1: (in, hidden)   pre-transposed first-layer weight
    b1: (hidden,)      first-layer bias
    w2: (hidden, out)  pre-transposed second-layer weight
    b2: (out,)         second-layer bias

    Zero-pads the hidden dim to a lane-dense multiple of 128 (exact under
    relu + matmul) and reshapes biases to 2-D row vectors.  Doing this here
    instead of per-forward removes 4 pad dispatches from every call.
    """
    K, H = w1.shape
    O = w2.shape[1]
    dtype = w1.dtype
    H_pad = _round_up(max(H, hidden_lane), hidden_lane)

    w1_p = jnp.zeros((K, H_pad), dtype).at[:, :H].set(w1)
    b1_p = jnp.zeros((1, H_pad), dtype).at[0, :H].set(b1)
    w2_p = jnp.zeros((H_pad, O), dtype).at[:H, :].set(w2)
    b2_p = b2.reshape(1, O).astype(dtype)
    return (w1_p, b1_p, w2_p, b2_p)


def linear_qnet_forward(x, params, *, max_batch_tile=2048):
    """Forward pass of Linear_QNet.

    x      : (B, in) activations (unpadded)
    params : output of prepare_qnet_params
    returns (B, out)
    """
    w1_p, b1_p, w2_p, b2_p = params
    B, K = x.shape
    H_pad = w1_p.shape[1]
    O = w2_p.shape[1]
    dtype = x.dtype

    # Balanced batch tiling: for B <= max_batch_tile run a single grid step on
    # the exact batch (no padding, no trailing slice).  Larger batches split
    # into balanced, 8-aligned tiles so v7x can shard them across both TCs.
    n_tiles = pl.cdiv(B, max_batch_tile)
    if n_tiles == 1:
        TB = B
        B_pad = B
        x_p = x
    else:
        TB = _round_up(pl.cdiv(B, n_tiles), 8)
        B_pad = n_tiles * TB
        x_p = jnp.zeros((B_pad, K), dtype).at[:B, :].set(x)

    out = pl.pallas_call(
        _qnet_kernel,
        out_shape=jax.ShapeDtypeStruct((B_pad, O), dtype),
        grid=(B_pad // TB,),
        in_specs=[
            # activation tile marches over the batch axis (K left unpadded)
            pl.BlockSpec((TB, K), lambda i: (i, 0)),
            # weights / biases stay VMEM-resident across grid steps
            pl.BlockSpec((K, H_pad), lambda i: (0, 0)),
            pl.BlockSpec((1, H_pad), lambda i: (0, 0)),
            pl.BlockSpec((H_pad, O), lambda i: (0, 0)),
            pl.BlockSpec((1, O), lambda i: (0, 0)),
        ],
        out_specs=pl.BlockSpec((TB, O), lambda i: (i, 0)),
        compiler_params=pltpu.CompilerParams(
            dimension_semantics=("parallel",)),
    )(x_p, w1_p, b1_p, w2_p, b2_p)

    if B_pad != B:
        out = out[:B]
    return out


if __name__ == "__main__":
    # Linear_QNet(input_size=11, hidden_size=32, output_size=3) — snake sizes.
    input_size, hidden_size, output_size = 11, 32, 3

    key = jax.random.PRNGKey(0)
    kx, kw1, kb1, kw2, kb2, kx_big = jax.random.split(key, 6)

    # PyTorch nn.Linear init style: uniform(-1/sqrt(fan_in), 1/sqrt(fan_in)),
    # weights stored (out, in) then transposed to (in, out) for the kernel.
    bound1 = 1.0 / float(jnp.sqrt(jnp.float32(input_size)))
    w1_pt = jax.random.uniform(kw1, (hidden_size, input_size),
                               minval=-bound1, maxval=bound1, dtype=jnp.float32)
    b1 = jax.random.uniform(kb1, (hidden_size,),
                            minval=-bound1, maxval=bound1, dtype=jnp.float32)

    bound2 = 1.0 / float(jnp.sqrt(jnp.float32(hidden_size)))
    w2_pt = jax.random.uniform(kw2, (output_size, hidden_size),
                               minval=-bound2, maxval=bound2, dtype=jnp.float32)
    b2 = jax.random.uniform(kb2, (output_size,),
                            minval=-bound2, maxval=bound2, dtype=jnp.float32)

    w1 = w1_pt.T  # (in, hidden)
    w2 = w2_pt.T  # (hidden, out)

    # One-time parameter prep (would live at model init / post-optimizer-step).
    params = jax.block_until_ready(prepare_qnet_params(w1, b1, w2, b2))

    # --- small inference-shaped batch (batch=2, the game-step path) ---
    batch = 2
    x = jax.random.normal(kx, (batch, input_size), dtype=jnp.float32)
    out = jax.block_until_ready(linear_qnet_forward(x, params))
    ref = jnp.maximum(x @ w1 + b1, 0.0) @ w2 + b2
    assert out.shape == (batch, output_size)
    assert jnp.allclose(out, ref, atol=1e-5, rtol=1e-5)

    # --- larger replay-buffer-shaped batch (single balanced tile, no padding) ---
    big_batch = 600
    x_big = jax.random.normal(kx_big, (big_batch, input_size), dtype=jnp.float32)
    out_big = jax.block_until_ready(linear_qnet_forward(x_big, params))
    ref_big = jnp.maximum(x_big @ w1 + b1, 0.0) @ w2 + b2
    assert out_big.shape == (big_batch, output_size)
    assert jnp.allclose(out_big, ref_big, atol=1e-5, rtol=1e-5)

    print("KERNEL_OK")
</pallas_src>

<mosaic_0001>
module attributes {stable_mosaic.version = 11 : i64} {
  func.func @_qnet_kernel(%arg0: i32, %arg1: memref<2x11xf32, #tpu.memory_space<vmem>>, %arg2: memref<11x128xf32, #tpu.memory_space<vmem>>, %arg3: memref<1x128xf32, #tpu.memory_space<vmem>>, %arg4: memref<128x3xf32, #tpu.memory_space<vmem>>, %arg5: memref<1x3xf32, #tpu.memory_space<vmem>>, %arg6: memref<2x3xf32, #tpu.memory_space<vmem>>) attributes {dimension_semantics = [#tpu.dimension_semantics<parallel>], iteration_bounds = array<i64: 1>, scalar_prefetch = 0 : i64, scratch_operands = 0 : i64, tpu.core_type = #tpu.core_type<tc>, window_params = [{transform_indices = @transform_0, window_bounds = array<i64: 2, 11>}, {pipeline_mode = #tpu.pipeline_mode<synchronous>, transform_indices = @transform_1, window_bounds = array<i64: 11, 128>}, {pipeline_mode = #tpu.pipeline_mode<synchronous>, transform_indices = @transform_2, window_bounds = array<i64: 1, 128>}, {pipeline_mode = #tpu.pipeline_mode<synchronous>, transform_indices = @transform_3, window_bounds = array<i64: 128, 3>}, {pipeline_mode = #tpu.pipeline_mode<synchronous>, transform_indices = @transform_4, window_bounds = array<i64: 1, 3>}, {transform_indices = @transform_5, window_bounds = array<i64: 2, 3>}]} {
    %c0 = arith.constant 0 : index
    %c0_0 = arith.constant 0 : index
    %0 = vector.load %arg1[%c0, %c0_0] : memref<2x11xf32, #tpu.memory_space<vmem>>, vector<2x11xf32>
    %c0_1 = arith.constant 0 : index
    %c0_2 = arith.constant 0 : index
    %1 = vector.load %arg2[%c0_1, %c0_2] : memref<11x128xf32, #tpu.memory_space<vmem>>, vector<11x128xf32>
    %cst = arith.constant dense<0.000000e+00> : vector<2x128xf32>
    %2 = tpu.matmul %0, %1, %cst {dimension_numbers = #tpu.dot_dimension_numbers<[1], [0], [0], [1], [0, 0, 1, 1], [], []>} : vector<2x11xf32>, vector<11x128xf32>, vector<2x128xf32> -> vector<2x128xf32>
    %c0_3 = arith.constant 0 : index
    %c0_4 = arith.constant 0 : index
    %3 = vector.load %arg3[%c0_3, %c0_4] : memref<1x128xf32, #tpu.memory_space<vmem>>, vector<1x128xf32>
    %4 = vector.broadcast %3 : vector<1x128xf32> to vector<2x128xf32>
    %5 = arith.addf %2, %4 : vector<2x128xf32>
    %cst_5 = arith.constant 0.000000e+00 : f32
    %6 = vector.broadcast %cst_5 : f32 to vector<2x128xf32>
    %7 = arith.maximumf %5, %6 : vector<2x128xf32>
    %c0_6 = arith.constant 0 : index
    %c0_7 = arith.constant 0 : index
    %8 = vector.load %arg4[%c0_6, %c0_7] : memref<128x3xf32, #tpu.memory_space<vmem>>, vector<128x3xf32>
    %cst_8 = arith.constant dense<0.000000e+00> : vector<2x3xf32>
    %9 = tpu.matmul %7, %8, %cst_8 {dimension_numbers = #tpu.dot_dimension_numbers<[1], [0], [0], [1], [0, 0, 1, 1], [], []>} : vector<2x128xf32>, vector<128x3xf32>, vector<2x3xf32> -> vector<2x3xf32>
    %c0_9 = arith.constant 0 : index
    %c0_10 = arith.constant 0 : index
    %10 = vector.load %arg5[%c0_9, %c0_10] : memref<1x3xf32, #tpu.memory_space<vmem>>, vector<1x3xf32>
    %11 = vector.broadcast %10 : vector<1x3xf32> to vector<2x3xf32>
    %12 = arith.addf %9, %11 : vector<2x3xf32>
    %c0_11 = arith.constant 0 : index
    %c0_12 = arith.constant 0 : index
    %13 = vector.load %arg6[%c0_11, %c0_12] : memref<2x3xf32, #tpu.memory_space<vmem>>, vector<2x3xf32>
    tpu.vector_store %arg6[%c0_11, %c0_12], %12 {strides = array<i32>} : memref<2x3xf32, #tpu.memory_space<vmem>>, vector<2x3xf32>,
    return
  }
  func.func @transform_0(%arg0: i32) -> (i32, i32) {
    %c0_i32 = arith.constant 0 : i32
    %c0_i32_0 = arith.constant 0 : i32
    return %arg0, %c0_i32 : i32, i32
  }
  func.func @transform_1(%arg0: i32) -> (i32, i32) {
    %c0_i32 = arith.constant 0 : i32
    %c0_i32_0 = arith.constant 0 : i32
    %c0_i32_1 = arith.constant 0 : i32
    return %c0_i32, %c0_i32_0 : i32, i32
  }
  func.func @transform_2(%arg0: i32) -> (i32, i32) {
    %c0_i32 = arith.constant 0 : i32
    %c0_i32_0 = arith.constant 0 : i32
    %c0_i32_1 = arith.constant 0 : i32
    return %c0_i32, %c0_i32_0 : i32, i32
  }
  func.func @transform_3(%arg0: i32) -> (i32, i32) {
    %c0_i32 = arith.constant 0 : i32
    %c0_i32_0 = arith.constant 0 : i32
    %c0_i32_1 = arith.constant 0 : i32
    return %c0_i32, %c0_i32_0 : i32, i32
  }
  func.func @transform_4(%arg0: i32) -> (i32, i32) {
    %c0_i32 = arith.constant 0 : i32
    %c0_i32_0 = arith.constant 0 : i32
    %c0_i32_1 = arith.constant 0 : i32
    return %c0_i32, %c0_i32_0 : i32, i32
  }
  func.func @transform_5(%arg0: i32) -> (i32, i32) {
    %c0_i32 = arith.constant 0 : i32
    %c0_i32_0 = arith.constant 0 : i32
    return %arg0, %c0_i32 : i32, i32
  }
}

</mosaic_0001>

<bundles_post_ra>
// kernel: tpu_custom_call.1
= control target key start
LH: loop header
LB: loop body
LE: loop exit
PB: predicated region body
PF: predicated region fallthrough
CT: control target
= control target key end

     0   :  { %vm35_vm0 = vcmask 1042432   ;;  %v342_v2 = vmov 0.0|0.0   ;;  %vm343_vm1 = vmmov 1   ;;  %vm344_vm3 = vmmov 0   ;;  %s452_s0 = inlined_call_operand.vmem [shape: f32[2,11], index: 0, kind: input, shape index: {}]   ;;  %s453_s1 = inlined_call_operand.vmem [shape: f32[11,128], index: 1, kind: input, shape index: {}]   ;;  %s454_s2 = inlined_call_operand.vmem [shape: f32[1,128], index: 2, kind: input, shape index: {}]   ;;  %s455_s3 = inlined_call_operand.vmem [shape: f32[128,3], index: 3, kind: input, shape index: {}]   ;;  %s456_s4 = inlined_call_operand.vmem [shape: f32[1,3], index: 4, kind: input, shape index: {}]   ;;  %s457_s5 = inlined_call_operand.hbm [shape: f32[2,3], index: 5, kind: output, shape index: {}]  }
   0x1   :  { %v22_v0 = vld [vmem:[%s453_s1] sm:$0xff]  ;;  %v23_v1 = vld [vmem:[%s453_s1 + $0x8] sm:$0x7]  ;;  %285 = vmatprep.subr.bf16.mxu0 %v342_v2  ;;  %vm287_vm2 = vmpackc.low %vm35_vm0, %vm343_vm1  ;;  %289 = vmatprep.subr.bf16.mxu1 %v342_v2  ;;  %v345_v5 = vmov 0.0   ;;  %vm31_vm4 = vcmask 89088  }
   0x2   :  { %v286_v3 = vpack.c.bf16 %v23_v1, %v22_v0  ;;  %v110_v4 = vld [vmem:[%s455_s3] sm:$0xff]  ;;  %247 = vmatprep.mubr.msk.f32.mxu0 %vm344_vm3, %v345_v5  ;;  %v111_v6 = vld [vmem:[%s455_s3 + $0x8] sm:$0xff]  ;;  %v112_v7 = vld [vmem:[%s455_s3 + $0x10] sm:$0xff]  ;;  %282 = vmatprep.mubr.msk.f32.mxu1 %vm344_vm3, %v345_v5 }
   0x3   :  { %v113_v8 = vld [vmem:[%s455_s3 + $0x18] sm:$0xff]  ;;  %v21_v9 = vld [vmem:[%s452_s0] sm:$0x3]  ;;  %v290_v10 = vpack.c.bf16 %v111_v6, %v110_v4  ;;  %v115_v13 = vld [vmem:[%s455_s3 + $0x28] sm:$0xff] }
   0x4   :  { %288 = vmatpush3.bf16.msk.msra.mxu0 %vm287_vm2, %v286_v3  ;;  %v293_v11 = vpack.c.bf16 %v113_v8, %v112_v7  ;;  %v114_v12 = vld [vmem:[%s455_s3 + $0x20] sm:$0xff] }
   0x5   :  { %291 = vmatpush3.bf16.msra.mxu1 %v290_v10 }
   0x6   :  { %292 = vmatprep.subr.bf16.mxu1 %v342_v2 }
   0x7   :  { %248 = vmatmul.mubr.msk.f32.vlgmr.msra.gmra.mrb[0].mxu0 %vm31_vm4, %v21_v9 }
   0x8   :  { %10 = vsyncpa [#allocation3], 0  ;;  %v296_v14 = vpack.c.bf16 %v115_v13, %v114_v12  ;;  %v116_v15 = vld [vmem:[%s455_s3 + $0x30] sm:$0xff]  ;;  %v117_v16 = vld [vmem:[%s455_s3 + $0x38] sm:$0xff]  ;;  %s346_s7 = smov [#allocation2]   ;;  %vm203_vm5 = vcmask 17408  }
   0x9   :  { %294 = vmatpush3.bf16.msra.mxu1 %v293_v11  ;;  %v299_v17 = vpack.c.bf16 %v117_v16, %v116_v15  ;;  %v118_v18 = vld [vmem:[%s455_s3 + $0x40] sm:$0xff]  ;;  %v119_v19 = vld [vmem:[%s455_s3 + $0x48] sm:$0xff]  ;;  %v120_v21 = vld [vmem:[%s455_s3 + $0x50] sm:$0xff]  ;;  %s211_s8 = sshll.u32 %s346_s7, 4  ;;  %s212_s8 = int_to_ptr.vmem [resolvable:$true] %s211_s8 }
   0xa   :  { %295 = vmatprep.subr.bf16.mxu1 %v342_v2  ;;  %v302_v20 = vpack.c.bf16 %v119_v19, %v118_v18  ;;  %v121_v22 = vld [vmem:[%s455_s3 + $0x58] sm:$0xff]  ;;  %v122_v24 = vld [vmem:[%s455_s3 + $0x60] sm:$0xff]  ;;  %v123_v25 = vld [vmem:[%s455_s3 + $0x68] sm:$0xff]  ;;  %p323_p1 = scmp.lt.s32.totalorder %s212_s8, %s212_s8 }
   0xb   :  { %v305_v23 = vpack.c.bf16 %v121_v22, %v120_v21  ;;  %v308_v26 = vpack.c.bf16 %v123_v25, %v122_v24  ;;  %v124_v27 = vld [vmem:[%s455_s3 + $0x70] sm:$0xff]  ;;  %v125_v28 = vld [vmem:[%s455_s3 + $0x78] sm:$0xff]  ;;  %v219_v30 = vld [vmem:[%s454_s2] ss:$0 sm:$0xff]  ;;  %s318_s3 = scalar_lea.vmem %s212_s8, 32 }
   0xc   :  { %v311_v29 = vpack.c.bf16 %v125_v28, %v124_v27  ;;  %v222_v35 = vld [vmem:[%s456_s4] ss:$0 sm:$0xff]  ;;  %p319_p0 = scmp.ne.s32.totalorder %s212_s8, %s318_s3  ;;  %p324_p2 = scmp.lt.s32.totalorder %s318_s3, %s318_s3 }
   0xd   :  { %297 = vmatpush3.bf16.msra.mxu1 %v296_v14 }
   0xe   :  { %298 = vmatprep.subr.bf16.mxu1 %v342_v2  ;;  %p325_p3 = por %p324_p2, %p323_p1 }
  0x10   :  { %p326_p4 = pnand %p325_p3, %p319_p0 }
  0x11   :  { %300 = vmatpush3.bf16.msra.mxu1 %v299_v17 }
  0x12   :  { %301 = vmatprep.subr.bf16.mxu1 %v342_v2 }
  0x15   :  { %303 = vmatpush3.bf16.msra.mxu1 %v302_v20 }
  0x16   :  { %304 = vmatprep.subr.bf16.mxu1 %v342_v2 }
  0x19   :  { %306 = vmatpush3.bf16.msra.mxu1 %v305_v23 }
  0x1a   :  { %307 = vmatprep.subr.bf16.mxu1 %v342_v2 }
  0x1d   :  { %309 = vmatpush3.bf16.msra.mxu1 %v308_v26 }
  0x1e   :  { %310 = vmatprep.subr.bf16.mxu1 %v342_v2 }
  0x21   :  { %312 = vmatpush3.bf16.msra.mxu1 %v311_v29 }
  0xda   :  { %v105_v31 = vpop.f32.mrb[0].mxu0 }
  0xdb   :  { %v106_v32 = vadd.f32 %v219_v30, %v105_v31  ;;  %v249_v33 = vpop.f32.mrb[1].mxu0 }
  0xdd   :  { %v109_v34 = vmax.f32 %v106_v32, 0.0 }
  0xdf   :  { %283 = vmatmul.mubr.f32.vlgmr.msra.gmra.mrb[0].mxu1 %v109_v34 }
 0x1b2   :  { %v199_v36 = vpop.f32.mrb[0].mxu1 }
 0x1b3   :  { %v200_v37 = vadd.f32 %v222_v35, %v199_v36  ;;  %v284_v38 = vpop.f32.mrb[1].mxu1 }
 0x1b5   :  { %204 = vst.msk [vmem:[#allocation2] sm:$0x3] %vm203_vm5, %v200_v37 }
 0x1b6   :  { %329 = shalt.err (!%p326_p4)
}
 0x1b7   :  { %s330_s10 = scalar_lea.hbm %s457_s5, 32 }
 0x1b8   :  { %p331_p5 = scmp.ne.s32.totalorder %s457_s5, %s330_s10  ;;  %p334_p6 = scmp.lt.u32.totalorder %s330_s10, %s457_s5 }
 0x1ba   :  { %p336_p7 = pnand %p334_p6, %p331_p5 }
 0x1bc   :  { %339 = shalt.err (!%p336_p7)
}
 0x1bd   :  { %214 = dma.vmem_to_hbm [thread:$0]  %s212_s8, 32, %s457_s5, [#allocation3]  }
 0x1be   :  { %340 = dma.done.wait [#allocation3], 32  }
 0x1bf   :  { %341 = vsyncadd [#allocation3], 4294967264 }
 0x1c0   :  { %218 = vsyncpa [#allocation3], 1 }

</bundles_post_ra>
